<compile_context>
chip_gen: v5e
topology: v5e:2x2
jax: 0.10.0
libtpu: 0.0.40
codegen_flags: <defaults>
</compile_context>

<pallas_src>
import functools

import jax
import jax.numpy as jnp
from jax import lax
from jax.experimental import pallas as pl
from jax.experimental.pallas import tpu as pltpu

LEAKY_SLOPE = 0.2


def _round_up(x, m):
    return ((x + m - 1) // m) * m


# ----------------------------------------------------------------------------
# Pallas kernel: fused matmul + (broadcast) bias + activation
# ----------------------------------------------------------------------------
def _matmul_bias_act_kernel(lhs_ref, rhs_ref, bias_ref, o_ref, *, activation):
    acc = jnp.dot(lhs_ref[...], rhs_ref[...], preferred_element_type=jnp.float32)
    acc = acc + bias_ref[...]          # bias is (Cout,1) or (1,N) -> broadcasts
    if activation == "leaky_relu":
        acc = jnp.where(acc >= 0, acc, LEAKY_SLOPE * acc)
    elif activation == "sigmoid":
        # exp on the EUP, approx reciprocal also on the EUP (free slot).
        acc = pl.reciprocal(1.0 + jnp.exp(-acc), approx=True)
    o_ref[...] = acc.astype(o_ref.dtype)


# ----------------------------------------------------------------------------
# out^T = act(W^T @ A^T + bias) for all phases of one deconv layer.
#   wt: (P, Cout, K)   at: (P, K, M)   bias: (Cout, 1)   ->  (P, Cout, M)
# Lane axis of the output is the big M = N*H*W axis (lane-dense stores).
# ----------------------------------------------------------------------------
def _fused_gemm_t(wt, at, bias, activation, out_dtype):
    P, Cout, K = wt.shape
    M = at.shape[2]
    tm = 512 if M >= 512 else _round_up(M, 128)
    Mp = _round_up(M, tm)
    if Mp != M:
        at = jnp.pad(at, ((0, 0), (0, 0), (0, Mp - M)))
    grid = (P, Mp // tm)

    out = pl.pallas_call(
        functools.partial(_matmul_bias_act_kernel, activation=activation),
        out_shape=jax.ShapeDtypeStruct((P, Cout, Mp), out_dtype),
        grid=grid,
        in_specs=[
            pl.BlockSpec((None, Cout, K), lambda p, i: (p, 0, 0)),
            pl.BlockSpec((None, K, tm), lambda p, i: (p, 0, i)),
            pl.BlockSpec((Cout, 1), lambda p, i: (0, 0)),
        ],
        out_specs=pl.BlockSpec((None, Cout, tm), lambda p, i: (p, 0, i)),
        compiler_params=pltpu.CompilerParams(
            dimension_semantics=("parallel", "parallel")),
    )(wt.astype(jnp.bfloat16), at.astype(jnp.bfloat16), bias.astype(jnp.float32))
    return out[:, :, :M]


# ----------------------------------------------------------------------------
# out = act(A @ B + bias) with rows tiled (used for the fused fc_z/fc_meta).
#   a: (M, K)   b: (K, N)   bias: (1, N)   ->  (M, N)   (N is lane-dense)
# ----------------------------------------------------------------------------
def _fused_gemm_rows(a, b, bias_row, activation, out_dtype):
    M, K = a.shape
    N = b.shape[1]
    tm = 256 if M >= 256 else _round_up(M, 8)
    Mp = _round_up(M, tm)
    if Mp != M:
        a = jnp.pad(a, ((0, Mp - M), (0, 0)))
    grid = (Mp // tm,)

    out = pl.pallas_call(
        functools.partial(_matmul_bias_act_kernel, activation=activation),
        out_shape=jax.ShapeDtypeStruct((Mp, N), out_dtype),
        grid=grid,
        in_specs=[
            pl.BlockSpec((tm, K), lambda i: (i, 0)),
            pl.BlockSpec((K, N), lambda i: (0, 0)),
            pl.BlockSpec((1, N), lambda i: (0, 0)),
        ],
        out_specs=pl.BlockSpec((tm, N), lambda i: (i, 0)),
        compiler_params=pltpu.CompilerParams(dimension_semantics=("parallel",)),
    )(a.astype(jnp.bfloat16), b.astype(jnp.bfloat16), bias_row.astype(jnp.float32))
    return out[:M]


# ----------------------------------------------------------------------------
# ConvTranspose2d via sub-pixel phase decomposition (activations in C,N,H,W).
# Requires kh % sh == 0 and 2*ph == kh - sh (holds for every layer here), so
# each of the sh*sw output phases is a stride-1 conv on the raw input with a
# (kh/sh, kw/sw)-tap kernel slice.
# ----------------------------------------------------------------------------
def conv_transpose_subpixel(x, W, b, stride, padding, activation, out_dtype):
    # x: (Cin, N, H, Wd)   W: (Cin, Cout, kh, kw)  [PyTorch ConvTranspose2d]
    Cin, Nb, H, Wd = x.shape
    _, Cout, kh, kw = W.shape
    sh, sw = stride
    ph, pw = padding
    assert kh % sh == 0 and kw % sw == 0
    assert 2 * ph == kh - sh and 2 * pw == kw - sw
    th, tw = kh // sh, kw // sw            # taps per phase in h / w

    def pads(s, p, t):
        qs = [(r + p) // s for r in range(s)]
        return max((t - 1) - min(qs), 0), max(max(qs), 0), qs

    lo_h, hi_h, q_h = pads(sh, ph, th)
    lo_w, hi_w, q_w = pads(sw, pw, tw)
    xp = jnp.pad(x, ((0, 0), (0, 0), (lo_h, hi_h), (lo_w, hi_w)))

    K = th * tw * Cin
    M = Nb * H * Wd

    at_list, wt_list = [], []
    for rh in range(sh):
        u0 = (rh + ph) % sh
        for rw in range(sw):
            v0 = (rw + pw) % sw
            # Patches^T for this phase: K ordered as (a, b, ci), M = (n, j, l).
            taps = []
            for a in range(th):
                hs = lo_h + q_h[rh] - a
                for bb in range(tw):
                    ws = lo_w + q_w[rw] - bb
                    taps.append(xp[:, :, hs:hs + H, ws:ws + Wd])
            at = jnp.stack(taps, axis=0).reshape(K, M)          # (K, M)
            at_list.append(at)
            # Matching weight slice: tap (a,b) <-> kernel index (u0+a*sh, v0+b*sw)
            u_idx = [u0 + a * sh for a in range(th)]
            v_idx = [v0 + bb * sw for bb in range(tw)]
            wsub = W[:, :, u_idx, :][:, :, :, v_idx]            # (Cin,Cout,th,tw)
            wt = wsub.transpose(1, 2, 3, 0).reshape(Cout, K)    # (Cout, K)
            wt_list.append(wt)

    at_all = jnp.stack(at_list, axis=0)      # (P, K, M)
    wt_all = jnp.stack(wt_list, axis=0)      # (P, Cout, K)

    out_t = _fused_gemm_t(wt_all, at_all, b.reshape(Cout, 1), activation,
                          out_dtype)         # (P, Cout, M)

    # Interleave phases back into the full spatial grid: (Cout, N, sh*H, sw*W).
    out = out_t.reshape(sh, sw, Cout, Nb, H, Wd)
    out = out.transpose(2, 3, 4, 0, 5, 1).reshape(Cout, Nb, sh * H, sw * Wd)
    return out


# ----------------------------------------------------------------------------
# Generator
# ----------------------------------------------------------------------------
def init_generator_params(key, instances_size, classes_size, meta_length, z_length):
    ds = instances_size

    def conv_t_params(k, cin, cout, kh, kw):
        k1, k2 = jax.random.split(k)
        scale = 1.0 / jnp.sqrt(jnp.float32(cin * kh * kw))
        W = jax.random.uniform(k1, (cin, cout, kh, kw), jnp.float32, -scale, scale)
        b = jax.random.uniform(k2, (cout,), jnp.float32, -scale, scale)
        return W, b

    keys = jax.random.split(key, 6)
    return {
        "fc_z":    conv_t_params(keys[0], z_length,    ds * 4, 4, 4),
        "fc_meta": conv_t_params(keys[1], meta_length, ds * 4, 4, 4),
        "deconv1": conv_t_params(keys[2], ds * 8, ds * 4, 4, 4),
        "deconv2": conv_t_params(keys[3], ds * 4, ds * 2, 4, 4),
        "deconv3": conv_t_params(keys[4], ds * 2, ds,     4, 1),
        "deconv4": conv_t_params(keys[5], ds,     classes_size, 4, 1),
    }


def generator_forward(params, z, meta):
    # z: (N, z_len, 1, 1), meta: (N, meta_len, 1, 1)  (NCHW, as in PyTorch)
    Nb = z.shape[0]
    Wz, bz = params["fc_z"]
    Wm, bm = params["fc_meta"]
    z_len, ds4, kh, kw = Wz.shape
    m_len = Wm.shape[0]
    kk = kh * kw

    # fc_z + fc_meta + channel-concat fused into one GEMM (block-diag weight).
    a = jnp.concatenate([z.reshape(Nb, z_len), meta.reshape(Nb, m_len)], axis=1)
    K = z_len + m_len
    Nout = 2 * ds4 * kk
    Bmat = jnp.zeros((K, Nout), jnp.float32)
    Bmat = Bmat.at[:z_len, :ds4 * kk].set(Wz.reshape(z_len, ds4 * kk))
    Bmat = Bmat.at[z_len:, ds4 * kk:].set(Wm.reshape(m_len, ds4 * kk))
    bias_row = jnp.concatenate([jnp.repeat(bz, kk), jnp.repeat(bm, kk)]).reshape(1, Nout)

    fc = _fused_gemm_rows(a, Bmat, bias_row, "leaky_relu", jnp.bfloat16)  # (N, 2*ds4*16)
    x = fc.reshape(Nb, 2 * ds4, kh, kw).transpose(1, 0, 2, 3)             # (8ds, N, 4, 4)

    x = conv_transpose_subpixel(x, *params["deconv1"], (2, 2), (1, 1), "leaky_relu", jnp.bfloat16)
    x = conv_transpose_subpixel(x, *params["deconv2"], (2, 2), (1, 1), "leaky_relu", jnp.bfloat16)
    x = conv_transpose_subpixel(x, *params["deconv3"], (2, 1), (1, 0), "leaky_relu", jnp.bfloat16)
    x = conv_transpose_subpixel(x, *params["deconv4"], (2, 1), (1, 0), "sigmoid",    jnp.float32)
    return x.transpose(1, 0, 2, 3)   # (N, classes, 8*ds, 2*ds)


# ----------------------------------------------------------------------------
# Pure-JAX reference (XLA conv, f32) for a correctness sanity check
# ----------------------------------------------------------------------------
def _ref_convT(x, W, b, stride, padding):
    kh, kw = W.shape[2], W.shape[3]
    ph, pw = padding
    Wc = jnp.flip(W, axis=(2, 3)).transpose(1, 0, 2, 3)  # (Cout, Cin, kh, kw)
    y = lax.conv_general_dilated(
        x, Wc, window_strides=(1, 1),
        padding=((kh - 1 - ph, kh - 1 - ph), (kw - 1 - pw, kw - 1 - pw)),
        lhs_dilation=stride, rhs_dilation=(1, 1),
        dimension_numbers=("NCHW", "OIHW", "NCHW"),
        precision=lax.Precision.HIGHEST)
    return y + b[None, :, None, None]


def _ref_forward(params, z, meta):
    lrelu = lambda v: jnp.where(v >= 0, v, LEAKY_SLOPE * v)
    fc_z = lrelu(_ref_convT(z,    *params["fc_z"],    (1, 1), (0, 0)))
    fc_m = lrelu(_ref_convT(meta, *params["fc_meta"], (1, 1), (0, 0)))
    fc = jnp.concatenate([fc_z, fc_m], axis=1)
    d1 = lrelu(_ref_convT(fc, *params["deconv1"], (2, 2), (1, 1)))
    d2 = lrelu(_ref_convT(d1, *params["deconv2"], (2, 2), (1, 1)))
    d3 = lrelu(_ref_convT(d2, *params["deconv3"], (2, 1), (1, 0)))
    d4 = jax.nn.sigmoid(_ref_convT(d3, *params["deconv4"], (2, 1), (1, 0)))
    return d4


if __name__ == "__main__":
    features_size = 16   # unused by the forward pass (same as the PyTorch module)
    instances_size = 8   # data_size
    classes_size = 2
    meta_length = 4
    z_length = 4
    batch = 2

    key = jax.random.PRNGKey(0)
    kp, kz, km = jax.random.split(key, 3)
    params = init_generator_params(kp, instances_size, classes_size, meta_length, z_length)

    z = jax.random.normal(kz, (batch, z_length, 1, 1), jnp.float32)
    meta = jax.random.normal(km, (batch, meta_length, 1, 1), jnp.float32)

    fwd = jax.jit(generator_forward)
    out = jax.block_until_ready(fwd(params, z, meta))

    expected_shape = (batch, classes_size, 8 * instances_size, 2 * instances_size)
    assert out.shape == expected_shape, (out.shape, expected_shape)

    ref = jax.block_until_ready(_ref_forward(params, z, meta))
    # bf16 MXU operands (f32 accumulator) vs the f32 reference: loosened tolerance.
    max_err = float(jnp.max(jnp.abs(out - ref)))
    assert max_err < 5e-2, f"mismatch vs reference: {max_err}"

    print("KERNEL_OK")
</pallas_src>

<mosaic_0001>
module attributes {stable_mosaic.version = 11 : i64} {
  func.func @_matmul_bias_act_kernel(%arg0: i32, %arg1: memref<8x8xbf16, #tpu.memory_space<vmem>>, %arg2: memref<8x1024xbf16, #tpu.memory_space<vmem>>, %arg3: memref<1x1024xf32, #tpu.memory_space<vmem>>, %arg4: memref<8x1024xbf16, #tpu.memory_space<vmem>>) attributes {dimension_semantics = [#tpu.dimension_semantics<parallel>], iteration_bounds = array<i64: 1>, scalar_prefetch = 0 : i64, scratch_operands = 0 : i64, tpu.core_type = #tpu.core_type<tc>, window_params = [{transform_indices = @transform_0, window_bounds = array<i64: 8, 8>}, {pipeline_mode = #tpu.pipeline_mode<synchronous>, transform_indices = @transform_1, window_bounds = array<i64: 8, 1024>}, {pipeline_mode = #tpu.pipeline_mode<synchronous>, transform_indices = @transform_2, window_bounds = array<i64: 1, 1024>}, {transform_indices = @transform_3, window_bounds = array<i64: 8, 1024>}]} {
    %c0 = arith.constant 0 : index
    %c0_0 = arith.constant 0 : index
    %0 = vector.load %arg1[%c0, %c0_0] : memref<8x8xbf16, #tpu.memory_space<vmem>>, vector<8x8xbf16>
    %c0_1 = arith.constant 0 : index
    %c0_2 = arith.constant 0 : index
    %1 = vector.load %arg2[%c0_1, %c0_2] : memref<8x1024xbf16, #tpu.memory_space<vmem>>, vector<8x1024xbf16>
    %cst = arith.constant dense<0.000000e+00> : vector<8x1024xf32>
    %2 = tpu.matmul %0, %1, %cst {dimension_numbers = #tpu.dot_dimension_numbers<[1], [0], [0], [1], [0, 0, 1, 1], [], []>} : vector<8x8xbf16>, vector<8x1024xbf16>, vector<8x1024xf32> -> vector<8x1024xf32>
    %c0_3 = arith.constant 0 : index
    %c0_4 = arith.constant 0 : index
    %3 = vector.load %arg3[%c0_3, %c0_4] : memref<1x1024xf32, #tpu.memory_space<vmem>>, vector<1x1024xf32>
    %4 = vector.broadcast %3 : vector<1x1024xf32> to vector<8x1024xf32>
    %5 = arith.addf %2, %4 : vector<8x1024xf32>
    %cst_5 = arith.constant 0.000000e+00 : f32
    %6 = vector.broadcast %cst_5 : f32 to vector<8x1024xf32>
    %7 = arith.cmpf oge, %5, %6 : vector<8x1024xf32>
    %cst_6 = arith.constant 2.000000e-01 : f32
    %8 = vector.broadcast %cst_6 : f32 to vector<8x1024xf32>
    %9 = arith.mulf %8, %5 : vector<8x1024xf32>
    %10 = arith.select %7, %5, %9 : vector<8x1024xi1>, vector<8x1024xf32>
    %11 = arith.truncf %10 : vector<8x1024xf32> to vector<8x1024xbf16>
    %c0_7 = arith.constant 0 : index
    %c0_8 = arith.constant 0 : index
    %12 = vector.load %arg4[%c0_7, %c0_8] : memref<8x1024xbf16, #tpu.memory_space<vmem>>, vector<8x1024xbf16>
    tpu.vector_store %arg4[%c0_7, %c0_8], %11 {strides = array<i32>} : memref<8x1024xbf16, #tpu.memory_space<vmem>>, vector<8x1024xbf16>,
    return
  }
  func.func @transform_0(%arg0: i32) -> (i32, i32) {
    %c0_i32 = arith.constant 0 : i32
    %c0_i32_0 = arith.constant 0 : i32
    return %arg0, %c0_i32 : i32, i32
  }
  func.func @transform_1(%arg0: i32) -> (i32, i32) {
    %c0_i32 = arith.constant 0 : i32
    %c0_i32_0 = arith.constant 0 : i32
    %c0_i32_1 = arith.constant 0 : i32
    return %c0_i32, %c0_i32_0 : i32, i32
  }
  func.func @transform_2(%arg0: i32) -> (i32, i32) {
    %c0_i32 = arith.constant 0 : i32
    %c0_i32_0 = arith.constant 0 : i32
    %c0_i32_1 = arith.constant 0 : i32
    return %c0_i32, %c0_i32_0 : i32, i32
  }
  func.func @transform_3(%arg0: i32) -> (i32, i32) {
    %c0_i32 = arith.constant 0 : i32
    %c0_i32_0 = arith.constant 0 : i32
    return %arg0, %c0_i32 : i32, i32
  }
}

module attributes {stable_mosaic.version = 11 : i64} {
  func.func @_matmul_bias_act_kernel(%arg0: i32, %arg1: i32, %arg2: memref<1x32x256xbf16, #tpu.memory_space<vmem>>, %arg3: memref<1x256x128xbf16, #tpu.memory_space<vmem>>, %arg4: memref<32x1xf32, #tpu.memory_space<vmem>>, %arg5: memref<1x32x128xbf16, #tpu.memory_space<vmem>>) attributes {dimension_semantics = [#tpu.dimension_semantics<parallel>, #tpu.dimension_semantics<parallel>], iteration_bounds = array<i64: 4, 1>, scalar_prefetch = 0 : i64, scratch_operands = 0 : i64, tpu.core_type = #tpu.core_type<tc>, window_params = [{transform_indices = @transform_0, window_bounds = array<i64: 1, 32, 256>}, {transform_indices = @transform_1, window_bounds = array<i64: 1, 256, 128>}, {pipeline_mode = #tpu.pipeline_mode<synchronous>, transform_indices = @transform_2, window_bounds = array<i64: 32, 1>}, {transform_indices = @transform_3, window_bounds = array<i64: 1, 32, 128>}]} {
    %c0 = arith.constant 0 : index
    %c0_0 = arith.constant 0 : index
    %c0_1 = arith.constant 0 : index
    %0 = vector.load %arg2[%c0, %c0_0, %c0_1] : memref<1x32x256xbf16, #tpu.memory_space<vmem>>, vector<1x32x256xbf16>
    %1 = vector.shape_cast %0 : vector<1x32x256xbf16> to vector<32x256xbf16>
    %c0_2 = arith.constant 0 : index
    %c0_3 = arith.constant 0 : index
    %c0_4 = arith.constant 0 : index
    %2 = vector.load %arg3[%c0_2, %c0_3, %c0_4] : memref<1x256x128xbf16, #tpu.memory_space<vmem>>, vector<1x256x128xbf16>
    %3 = vector.shape_cast %2 : vector<1x256x128xbf16> to vector<256x128xbf16>
    %cst = arith.constant dense<0.000000e+00> : vector<32x128xf32>
    %4 = tpu.matmul %1, %3, %cst {dimension_numbers = #tpu.dot_dimension_numbers<[1], [0], [0], [1], [0, 0, 1, 1], [], []>} : vector<32x256xbf16>, vector<256x128xbf16>, vector<32x128xf32> -> vector<32x128xf32>
    %c0_5 = arith.constant 0 : index
    %c0_6 = arith.constant 0 : index
    %5 = vector.load %arg4[%c0_5, %c0_6] : memref<32x1xf32, #tpu.memory_space<vmem>>, vector<32x1xf32>
    %6 = vector.broadcast %5 : vector<32x1xf32> to vector<32x128xf32>
    %7 = arith.addf %4, %6 : vector<32x128xf32>
    %cst_7 = arith.constant 0.000000e+00 : f32
    %8 = vector.broadcast %cst_7 : f32 to vector<32x128xf32>
    %9 = arith.cmpf oge, %7, %8 : vector<32x128xf32>
    %cst_8 = arith.constant 2.000000e-01 : f32
    %10 = vector.broadcast %cst_8 : f32 to vector<32x128xf32>
    %11 = arith.mulf %10, %7 : vector<32x128xf32>
    %12 = arith.select %9, %7, %11 : vector<32x128xi1>, vector<32x128xf32>
    %13 = arith.truncf %12 : vector<32x128xf32> to vector<32x128xbf16>
    %c0_9 = arith.constant 0 : index
    %c0_10 = arith.constant 0 : index
    %c0_11 = arith.constant 0 : index
    %14 = vector.load %arg5[%c0_9, %c0_10, %c0_11] : memref<1x32x128xbf16, #tpu.memory_space<vmem>>, vector<1x32x128xbf16>
    %15 = vector.shape_cast %14 : vector<1x32x128xbf16> to vector<32x128xbf16>
    %16 = vector.shape_cast %13 : vector<32x128xbf16> to vector<1x32x128xbf16>
    tpu.vector_store %arg5[%c0_9, %c0_10, %c0_11], %16 {strides = array<i32>} : memref<1x32x128xbf16, #tpu.memory_space<vmem>>, vector<1x32x128xbf16>,
    return
  }
  func.func @transform_0(%arg0: i32, %arg1: i32) -> (i32, i32, i32) {
    %c0_i32 = arith.constant 0 : i32
    %c0_i32_0 = arith.constant 0 : i32
    %c0_i32_1 = arith.constant 0 : i32
    return %arg0, %c0_i32, %c0_i32_0 : i32, i32, i32
  }
  func.func @transform_1(%arg0: i32, %arg1: i32) -> (i32, i32, i32) {
    %c0_i32 = arith.constant 0 : i32
    %c0_i32_0 = arith.constant 0 : i32
    return %arg0, %c0_i32, %arg1 : i32, i32, i32
  }
  func.func @transform_2(%arg0: i32, %arg1: i32) -> (i32, i32) {
    %c0_i32 = arith.constant 0 : i32
    %c0_i32_0 = arith.constant 0 : i32
    %c0_i32_1 = arith.constant 0 : i32
    return %c0_i32, %c0_i32_0 : i32, i32
  }
  func.func @transform_3(%arg0: i32, %arg1: i32) -> (i32, i32, i32) {
    %c0_i32 = arith.constant 0 : i32
    %c0_i32_0 = arith.constant 0 : i32
    return %arg0, %c0_i32, %arg1 : i32, i32, i32
  }
}

module attributes {stable_mosaic.version = 11 : i64} {
  func.func @_matmul_bias_act_kernel(%arg0: i32, %arg1: i32, %arg2: memref<1x16x128xbf16, #tpu.memory_space<vmem>>, %arg3: memref<1x128x128xbf16, #tpu.memory_space<vmem>>, %arg4: memref<16x1xf32, #tpu.memory_space<vmem>>, %arg5: memref<1x16x128xbf16, #tpu.memory_space<vmem>>) attributes {dimension_semantics = [#tpu.dimension_semantics<parallel>, #tpu.dimension_semantics<parallel>], iteration_bounds = array<i64: 4, 1>, scalar_prefetch = 0 : i64, scratch_operands = 0 : i64, tpu.core_type = #tpu.core_type<tc>, window_params = [{transform_indices = @transform_0, window_bounds = array<i64: 1, 16, 128>}, {transform_indices = @transform_1, window_bounds = array<i64: 1, 128, 128>}, {pipeline_mode = #tpu.pipeline_mode<synchronous>, transform_indices = @transform_2, window_bounds = array<i64: 16, 1>}, {transform_indices = @transform_3, window_bounds = array<i64: 1, 16, 128>}]} {
    %c0 = arith.constant 0 : index
    %c0_0 = arith.constant 0 : index
    %c0_1 = arith.constant 0 : index
    %0 = vector.load %arg2[%c0, %c0_0, %c0_1] : memref<1x16x128xbf16, #tpu.memory_space<vmem>>, vector<1x16x128xbf16>
    %1 = vector.shape_cast %0 : vector<1x16x128xbf16> to vector<16x128xbf16>
    %c0_2 = arith.constant 0 : index
    %c0_3 = arith.constant 0 : index
    %c0_4 = arith.constant 0 : index
    %2 = vector.load %arg3[%c0_2, %c0_3, %c0_4] : memref<1x128x128xbf16, #tpu.memory_space<vmem>>, vector<1x128x128xbf16>
    %3 = vector.shape_cast %2 : vector<1x128x128xbf16> to vector<128x128xbf16>
    %cst = arith.constant dense<0.000000e+00> : vector<16x128xf32>
    %4 = tpu.matmul %1, %3, %cst {dimension_numbers = #tpu.dot_dimension_numbers<[1], [0], [0], [1], [0, 0, 1, 1], [], []>} : vector<16x128xbf16>, vector<128x128xbf16>, vector<16x128xf32> -> vector<16x128xf32>
    %c0_5 = arith.constant 0 : index
    %c0_6 = arith.constant 0 : index
    %5 = vector.load %arg4[%c0_5, %c0_6] : memref<16x1xf32, #tpu.memory_space<vmem>>, vector<16x1xf32>
    %6 = vector.broadcast %5 : vector<16x1xf32> to vector<16x128xf32>
    %7 = arith.addf %4, %6 : vector<16x128xf32>
    %cst_7 = arith.constant 0.000000e+00 : f32
    %8 = vector.broadcast %cst_7 : f32 to vector<16x128xf32>
    %9 = arith.cmpf oge, %7, %8 : vector<16x128xf32>
    %cst_8 = arith.constant 2.000000e-01 : f32
    %10 = vector.broadcast %cst_8 : f32 to vector<16x128xf32>
    %11 = arith.mulf %10, %7 : vector<16x128xf32>
    %12 = arith.select %9, %7, %11 : vector<16x128xi1>, vector<16x128xf32>
    %13 = arith.truncf %12 : vector<16x128xf32> to vector<16x128xbf16>
    %c0_9 = arith.constant 0 : index
    %c0_10 = arith.constant 0 : index
    %c0_11 = arith.constant 0 : index
    %14 = vector.load %arg5[%c0_9, %c0_10, %c0_11] : memref<1x16x128xbf16, #tpu.memory_space<vmem>>, vector<1x16x128xbf16>
    %15 = vector.shape_cast %14 : vector<1x16x128xbf16> to vector<16x128xbf16>
    %16 = vector.shape_cast %13 : vector<16x128xbf16> to vector<1x16x128xbf16>
    tpu.vector_store %arg5[%c0_9, %c0_10, %c0_11], %16 {strides = array<i32>} : memref<1x16x128xbf16, #tpu.memory_space<vmem>>, vector<1x16x128xbf16>,
    return
  }
  func.func @transform_0(%arg0: i32, %arg1: i32) -> (i32, i32, i32) {
    %c0_i32 = arith.constant 0 : i32
    %c0_i32_0 = arith.constant 0 : i32
    %c0_i32_1 = arith.constant 0 : i32
    return %arg0, %c0_i32, %c0_i32_0 : i32, i32, i32
  }
  func.func @transform_1(%arg0: i32, %arg1: i32) -> (i32, i32, i32) {
    %c0_i32 = arith.constant 0 : i32
    %c0_i32_0 = arith.constant 0 : i32
    return %arg0, %c0_i32, %arg1 : i32, i32, i32
  }
  func.func @transform_2(%arg0: i32, %arg1: i32) -> (i32, i32) {
    %c0_i32 = arith.constant 0 : i32
    %c0_i32_0 = arith.constant 0 : i32
    %c0_i32_1 = arith.constant 0 : i32
    return %c0_i32, %c0_i32_0 : i32, i32
  }
  func.func @transform_3(%arg0: i32, %arg1: i32) -> (i32, i32, i32) {
    %c0_i32 = arith.constant 0 : i32
    %c0_i32_0 = arith.constant 0 : i32
    return %arg0, %c0_i32, %arg1 : i32, i32, i32
  }
}

module attributes {stable_mosaic.version = 11 : i64} {
  func.func @_matmul_bias_act_kernel(%arg0: i32, %arg1: i32, %arg2: memref<1x8x32xbf16, #tpu.memory_space<vmem>>, %arg3: memref<1x32x512xbf16, #tpu.memory_space<vmem>>, %arg4: memref<8x1xf32, #tpu.memory_space<vmem>>, %arg5: memref<1x8x512xbf16, #tpu.memory_space<vmem>>) attributes {dimension_semantics = [#tpu.dimension_semantics<parallel>, #tpu.dimension_semantics<parallel>], iteration_bounds = array<i64: 2, 1>, scalar_prefetch = 0 : i64, scratch_operands = 0 : i64, tpu.core_type = #tpu.core_type<tc>, window_params = [{transform_indices = @transform_0, window_bounds = array<i64: 1, 8, 32>}, {transform_indices = @transform_1, window_bounds = array<i64: 1, 32, 512>}, {pipeline_mode = #tpu.pipeline_mode<synchronous>, transform_indices = @transform_2, window_bounds = array<i64: 8, 1>}, {transform_indices = @transform_3, window_bounds = array<i64: 1, 8, 512>}]} {
    %c0 = arith.constant 0 : index
    %c0_0 = arith.constant 0 : index
    %c0_1 = arith.constant 0 : index
    %0 = vector.load %arg2[%c0, %c0_0, %c0_1] : memref<1x8x32xbf16, #tpu.memory_space<vmem>>, vector<1x8x32xbf16>
    %1 = vector.shape_cast %0 : vector<1x8x32xbf16> to vector<8x32xbf16>
    %c0_2 = arith.constant 0 : index
    %c0_3 = arith.constant 0 : index
    %c0_4 = arith.constant 0 : index
    %2 = vector.load %arg3[%c0_2, %c0_3, %c0_4] : memref<1x32x512xbf16, #tpu.memory_space<vmem>>, vector<1x32x512xbf16>
    %3 = vector.shape_cast %2 : vector<1x32x512xbf16> to vector<32x512xbf16>
    %cst = arith.constant dense<0.000000e+00> : vector<8x512xf32>
    %4 = tpu.matmul %1, %3, %cst {dimension_numbers = #tpu.dot_dimension_numbers<[1], [0], [0], [1], [0, 0, 1, 1], [], []>} : vector<8x32xbf16>, vector<32x512xbf16>, vector<8x512xf32> -> vector<8x512xf32>
    %c0_5 = arith.constant 0 : index
    %c0_6 = arith.constant 0 : index
    %5 = vector.load %arg4[%c0_5, %c0_6] : memref<8x1xf32, #tpu.memory_space<vmem>>, vector<8x1xf32>
    %6 = vector.broadcast %5 : vector<8x1xf32> to vector<8x512xf32>
    %7 = arith.addf %4, %6 : vector<8x512xf32>
    %cst_7 = arith.constant 0.000000e+00 : f32
    %8 = vector.broadcast %cst_7 : f32 to vector<8x512xf32>
    %9 = arith.cmpf oge, %7, %8 : vector<8x512xf32>
    %cst_8 = arith.constant 2.000000e-01 : f32
    %10 = vector.broadcast %cst_8 : f32 to vector<8x512xf32>
    %11 = arith.mulf %10, %7 : vector<8x512xf32>
    %12 = arith.select %9, %7, %11 : vector<8x512xi1>, vector<8x512xf32>
    %13 = arith.truncf %12 : vector<8x512xf32> to vector<8x512xbf16>
    %c0_9 = arith.constant 0 : index
    %c0_10 = arith.constant 0 : index
    %c0_11 = arith.constant 0 : index
    %14 = vector.load %arg5[%c0_9, %c0_10, %c0_11] : memref<1x8x512xbf16, #tpu.memory_space<vmem>>, vector<1x8x512xbf16>
    %15 = vector.shape_cast %14 : vector<1x8x512xbf16> to vector<8x512xbf16>
    %16 = vector.shape_cast %13 : vector<8x512xbf16> to vector<1x8x512xbf16>
    tpu.vector_store %arg5[%c0_9, %c0_10, %c0_11], %16 {strides = array<i32>} : memref<1x8x512xbf16, #tpu.memory_space<vmem>>, vector<1x8x512xbf16>,
    return
  }
  func.func @transform_0(%arg0: i32, %arg1: i32) -> (i32, i32, i32) {
    %c0_i32 = arith.constant 0 : i32
    %c0_i32_0 = arith.constant 0 : i32
    %c0_i32_1 = arith.constant 0 : i32
    return %arg0, %c0_i32, %c0_i32_0 : i32, i32, i32
  }
  func.func @transform_1(%arg0: i32, %arg1: i32) -> (i32, i32, i32) {
    %c0_i32 = arith.constant 0 : i32
    %c0_i32_0 = arith.constant 0 : i32
    return %arg0, %c0_i32, %arg1 : i32, i32, i32
  }
  func.func @transform_2(%arg0: i32, %arg1: i32) -> (i32, i32) {
    %c0_i32 = arith.constant 0 : i32
    %c0_i32_0 = arith.constant 0 : i32
    %c0_i32_1 = arith.constant 0 : i32
    return %c0_i32, %c0_i32_0 : i32, i32
  }
  func.func @transform_3(%arg0: i32, %arg1: i32) -> (i32, i32, i32) {
    %c0_i32 = arith.constant 0 : i32
    %c0_i32_0 = arith.constant 0 : i32
    return %arg0, %c0_i32, %arg1 : i32, i32, i32
  }
}

module attributes {stable_mosaic.version = 11 : i64} {
  func.func @_matmul_bias_act_kernel(%arg0: i32, %arg1: i32, %arg2: memref<1x2x16xbf16, #tpu.memory_space<vmem>>, %arg3: memref<1x16x512xbf16, #tpu.memory_space<vmem>>, %arg4: memref<2x1xf32, #tpu.memory_space<vmem>>, %arg5: memref<1x2x512xf32, #tpu.memory_space<vmem>>) attributes {dimension_semantics = [#tpu.dimension_semantics<parallel>, #tpu.dimension_semantics<parallel>], iteration_bounds = array<i64: 2, 2>, scalar_prefetch = 0 : i64, scratch_operands = 0 : i64, tpu.core_type = #tpu.core_type<tc>, window_params = [{transform_indices = @transform_0, window_bounds = array<i64: 1, 2, 16>}, {transform_indices = @transform_1, window_bounds = array<i64: 1, 16, 512>}, {pipeline_mode = #tpu.pipeline_mode<synchronous>, transform_indices = @transform_2, window_bounds = array<i64: 2, 1>}, {transform_indices = @transform_3, window_bounds = array<i64: 1, 2, 512>}]} {
    %c0 = arith.constant 0 : index
    %c0_0 = arith.constant 0 : index
    %c0_1 = arith.constant 0 : index
    %0 = vector.load %arg2[%c0, %c0_0, %c0_1] : memref<1x2x16xbf16, #tpu.memory_space<vmem>>, vector<1x2x16xbf16>
    %1 = vector.shape_cast %0 : vector<1x2x16xbf16> to vector<2x16xbf16>
    %c0_2 = arith.constant 0 : index
    %c0_3 = arith.constant 0 : index
    %c0_4 = arith.constant 0 : index
    %2 = vector.load %arg3[%c0_2, %c0_3, %c0_4] : memref<1x16x512xbf16, #tpu.memory_space<vmem>>, vector<1x16x512xbf16>
    %3 = vector.shape_cast %2 : vector<1x16x512xbf16> to vector<16x512xbf16>
    %cst = arith.constant dense<0.000000e+00> : vector<2x512xf32>
    %4 = tpu.matmul %1, %3, %cst {dimension_numbers = #tpu.dot_dimension_numbers<[1], [0], [0], [1], [0, 0, 1, 1], [], []>} : vector<2x16xbf16>, vector<16x512xbf16>, vector<2x512xf32> -> vector<2x512xf32>
    %c0_5 = arith.constant 0 : index
    %c0_6 = arith.constant 0 : index
    %5 = vector.load %arg4[%c0_5, %c0_6] : memref<2x1xf32, #tpu.memory_space<vmem>>, vector<2x1xf32>
    %6 = vector.broadcast %5 : vector<2x1xf32> to vector<2x512xf32>
    %7 = arith.addf %4, %6 : vector<2x512xf32>
    %cst_7 = arith.constant 0.000000e+00 : f32
    %8 = vector.broadcast %cst_7 : f32 to vector<2x512xf32>
    %9 = arith.subf %8, %7 : vector<2x512xf32>
    %10 = math.exp %9 : vector<2x512xf32>
    %cst_8 = arith.constant 1.000000e+00 : f32
    %11 = vector.broadcast %cst_8 : f32 to vector<2x512xf32>
    %12 = arith.addf %11, %10 : vector<2x512xf32>
    %13 = tpu.reciprocal %12 {approx = true} : vector<2x512xf32> -> vector<2x512xf32>
    %c0_9 = arith.constant 0 : index
    %c0_10 = arith.constant 0 : index
    %c0_11 = arith.constant 0 : index
    %14 = vector.load %arg5[%c0_9, %c0_10, %c0_11] : memref<1x2x512xf32, #tpu.memory_space<vmem>>, vector<1x2x512xf32>
    %15 = vector.shape_cast %14 : vector<1x2x512xf32> to vector<2x512xf32>
    %16 = vector.shape_cast %13 : vector<2x512xf32> to vector<1x2x512xf32>
    tpu.vector_store %arg5[%c0_9, %c0_10, %c0_11], %16 {strides = array<i32>} : memref<1x2x512xf32, #tpu.memory_space<vmem>>, vector<1x2x512xf32>,
    return
  }
  func.func @transform_0(%arg0: i32, %arg1: i32) -> (i32, i32, i32) {
    %c0_i32 = arith.constant 0 : i32
    %c0_i32_0 = arith.constant 0 : i32
    %c0_i32_1 = arith.constant 0 : i32
    return %arg0, %c0_i32, %c0_i32_0 : i32, i32, i32
  }
  func.func @transform_1(%arg0: i32, %arg1: i32) -> (i32, i32, i32) {
    %c0_i32 = arith.constant 0 : i32
    %c0_i32_0 = arith.constant 0 : i32
    return %arg0, %c0_i32, %arg1 : i32, i32, i32
  }
  func.func @transform_2(%arg0: i32, %arg1: i32) -> (i32, i32) {
    %c0_i32 = arith.constant 0 : i32
    %c0_i32_0 = arith.constant 0 : i32
    %c0_i32_1 = arith.constant 0 : i32
    return %c0_i32, %c0_i32_0 : i32, i32
  }
  func.func @transform_3(%arg0: i32, %arg1: i32) -> (i32, i32, i32) {
    %c0_i32 = arith.constant 0 : i32
    %c0_i32_0 = arith.constant 0 : i32
    return %arg0, %c0_i32, %arg1 : i32, i32, i32
  }
}

</mosaic_0001>

<bundles_post_ra>
// kernel: generator_forward.5
= control target key start
LH: loop header
LB: loop body
LE: loop exit
PB: predicated region body
PF: predicated region fallthrough
CT: control target
= control target key end

     0   :  { %vm62_vm0 = vcmask 1043456   ;;  %vm58_vm1 = vcmask 64512   ;;  %s301_s1 = inlined_call_operand.vmem [shape: bf16[8,1024], index: 1, kind: input, shape index: {}]   ;;  %s302_s0 = inlined_call_operand.vmem [shape: bf16[8,8], index: 0, kind: input, shape index: {}]   ;;  %s303_s2 = inlined_call_operand.vmem [shape: f32[1,1024], index: 2, kind: input, shape index: {}]   ;;  %s304_s3 = inlined_call_operand.vmem [shape: bf16[8,1024], index: 3, kind: output, shape index: {}]  }
   0x1   :  { %v16_v0 = vld [vmem:[%s301_s1] sm:$0xff]  ;;  %v17_v1 = vld [vmem:[%s301_s1 + $0x8] sm:$0xff]  ;;  %v19_v6 = vld [vmem:[%s301_s1 + $0x18] sm:$0xff] }
   0x2   :  { %v42_v2 = vunpack.c.l.b16 %v16_v0  ;;  %v43_v3 = vunpack.c.h.b16 %v16_v0  ;;  %v44_v4 = vunpack.c.l.b16 %v17_v1  ;;  %v45_v5 = vunpack.c.h.b16 %v17_v1  ;;  %v18_v7 = vld [vmem:[%s301_s1 + $0x10] sm:$0xff]  ;;  %v15_v24 = vld [vmem:[%s302_s0] sm:$0xf] }
   0x3   :  { %v48_v8 = vunpack.c.l.b16 %v19_v6  ;;  %v49_v9 = vunpack.c.h.b16 %v19_v6  ;;  %v46_v10 = vunpack.c.l.b16 %v18_v7  ;;  %v47_v11 = vunpack.c.h.b16 %v18_v7  ;;  %v20_v29 = vld [vmem:[%s303_s2] sm:$0xff] }
   0x4   :  { %v50_v12 = vpack.c.b16 %v42_v2, %v42_v2  ;;  %v51_v13 = vpack.c.b16 %v43_v3, %v43_v3  ;;  %v52_v14 = vpack.c.b16 %v44_v4, %v44_v4  ;;  %v53_v15 = vpack.c.b16 %v45_v5, %v45_v5 }
   0x5   :  { %v56_v16 = vpack.c.b16 %v48_v8, %v48_v8  ;;  %v57_v17 = vpack.c.b16 %v49_v9, %v49_v9  ;;  %v54_v18 = vpack.c.b16 %v46_v10, %v46_v10  ;;  %v55_v19 = vpack.c.b16 %v47_v11, %v47_v11 }
   0x6   :  { %v64_v20 = vsel %vm62_vm0, %v50_v12, 0  ;;  %v67_v21 = vsel %vm62_vm0, %v51_v13, 0  ;;  %v70_v22 = vsel %vm62_vm0, %v52_v14, 0  ;;  %v73_v23 = vsel %vm62_vm0, %v53_v15, 0 }
   0x7   :  { %94 = vmatpush.bf16.msra.mxu0 %v64_v20  ;;  %107 = vmatpush.bf16.msra.mxu1 %v67_v21  ;;  %v82_v25 = vsel %vm62_vm0, %v56_v16, 0  ;;  %v85_v26 = vsel %vm62_vm0, %v57_v17, 0  ;;  %v76_v27 = vsel %vm62_vm0, %v54_v18, 0  ;;  %v79_v28 = vsel %vm62_vm0, %v55_v19, 0 }
   0x8   :  { %120 = vmatpush.bf16.msra.mxu2 %v70_v22  ;;  %133 = vmatpush.bf16.msra.mxu3 %v73_v23  ;;  %v22_v30 = vperm.slane %v20_v29, 0  ;;  %v23_v31 = vperm.slane %v20_v29, 1  ;;  %v24_v38 = vperm.slane %v20_v29, 2  ;;  %v25_v39 = vperm.slane %v20_v29, 3 }
   0x9   :  { %v26_v54 = vperm.slane %v20_v29, 4  ;;  %v27_v55 = vperm.slane %v20_v29, 5  ;;  %v28_v0 = vperm.slane %v20_v29, 6  ;;  %v29_v1 = vperm.slane %v20_v29, 7 }
   0xa   :  { %227 = vmatmul.msk.bf16.vlgmr.msra.gmra.mxu0 %vm58_vm1, %v15_v24  ;;  %228 = vmatmul.msk.bf16.vlgmr.msra.gmra.mxu1 %vm58_vm1, %v15_v24 }
   0xb   :  { %229 = vmatmul.msk.bf16.vlgmr.msra.gmra.mxu2 %vm58_vm1, %v15_v24  ;;  %230 = vmatmul.msk.bf16.vlgmr.msra.gmra.mxu3 %vm58_vm1, %v15_v24 }
   0xc   :  { %172 = vmatpush.bf16.msrb.mxu2 %v82_v25  ;;  %185 = vmatpush.bf16.msrb.mxu3 %v85_v26 }
   0xd   :  { %146 = vmatpush.bf16.msrb.mxu0 %v76_v27  ;;  %159 = vmatpush.bf16.msrb.mxu1 %v79_v28 }
  0x1a   :  { %231 = vmatmul.msk.bf16.vlgmr.msrb.gmra.mxu0 %vm58_vm1, %v15_v24  ;;  %232 = vmatmul.msk.bf16.vlgmr.msrb.gmra.mxu1 %vm58_vm1, %v15_v24 }
  0x1b   :  { %233 = vmatmul.msk.bf16.vlgmr.msrb.gmra.mxu2 %vm58_vm1, %v15_v24  ;;  %234 = vmatmul.msk.bf16.vlgmr.msrb.gmra.mxu3 %vm58_vm1, %v15_v24 }
  0x87   :  { %v96_v32 = vpop.f32.mrf.mxu0  ;;  %v109_v33 = vpop.f32.mrf.mxu1 }
  0x88   :  { %v97_v34 = vadd.f32 %v96_v32, %v22_v30  ;;  %v110_v35 = vadd.f32 %v109_v33, %v23_v31 }
  0x8a   :  { %vm191_vm2 = vcmp.ge.f32.partialorder %v97_v34, 0.0  ;;  %v199_v36 = vmul.f32 0.2, %v97_v34  ;;  %vm192_vm3 = vcmp.ge.f32.partialorder %v110_v35, 0.0  ;;  %v200_v37 = vmul.f32 0.2, %v110_v35 }
  0x8c   :  { %v207_v40 = vsel %vm191_vm2, %v97_v34, %v199_v36  ;;  %v208_v41 = vsel %vm192_vm3, %v110_v35, %v200_v37 }
  0x8d   :  { %v215_v42 = vpack.c.bf16 %v208_v41, %v207_v40 }
  0x8e   :  { %v122_v43 = vpop.f32.mrf.mxu2  ;;  %v135_v44 = vpop.f32.mrf.mxu3 }
  0x8f   :  { %219 = vst [vmem:[%s304_s3] sm:$0xff] %v215_v42  ;;  %v123_v45 = vadd.f32 %v122_v43, %v24_v38  ;;  %v136_v46 = vadd.f32 %v135_v44, %v25_v39  ;;  %v98_v47 = vpop.f32.mrf.mxu0  ;;  %v111_v48 = vpop.f32.mrf.mxu1 }
  0x91   :  { %vm193_vm4 = vcmp.ge.f32.partialorder %v123_v45, 0.0  ;;  %v201_v49 = vmul.f32 0.2, %v123_v45  ;;  %vm194_vm5 = vcmp.ge.f32.partialorder %v136_v46, 0.0  ;;  %v202_v50 = vmul.f32 0.2, %v136_v46 }
  0x93   :  { %v209_v51 = vsel %vm193_vm4, %v123_v45, %v201_v49  ;;  %v210_v52 = vsel %vm194_vm5, %v136_v46, %v202_v50 }
  0x94   :  { %v216_v53 = vpack.c.bf16 %v210_v52, %v209_v51 }
  0x96   :  { %220 = vst [vmem:[%s304_s3 + $0x8] sm:$0xff] %v216_v53  ;;  %v124_v56 = vpop.f32.mrf.mxu2  ;;  %v137_v57 = vpop.f32.mrf.mxu3 }
  0x97   :  { %v148_v58 = vpop.f32.mrf.mxu0  ;;  %v161_v59 = vpop.f32.mrf.mxu1 }
  0x98   :  { %v149_v60 = vadd.f32 %v148_v58, %v26_v54  ;;  %v162_v61 = vadd.f32 %v161_v59, %v27_v55 }
  0x9a   :  { %vm195_vm6 = vcmp.ge.f32.partialorder %v149_v60, 0.0  ;;  %v203_v62 = vmul.f32 0.2, %v149_v60  ;;  %vm196_vm7 = vcmp.ge.f32.partialorder %v162_v61, 0.0  ;;  %v204_v63 = vmul.f32 0.2, %v162_v61 }
  0x9c   :  { %v211_v2 = vsel %vm195_vm6, %v149_v60, %v203_v62  ;;  %v212_v3 = vsel %vm196_vm7, %v162_v61, %v204_v63 }
  0x9d   :  { %v217_v4 = vpack.c.bf16 %v212_v3, %v211_v2 }
  0x9e   :  { %v174_v5 = vpop.f32.mrf.mxu2  ;;  %v187_v6 = vpop.f32.mrf.mxu3 }
  0x9f   :  { %221 = vst [vmem:[%s304_s3 + $0x10] sm:$0xff] %v217_v4  ;;  %v175_v7 = vadd.f32 %v174_v5, %v28_v0  ;;  %v188_v8 = vadd.f32 %v187_v6, %v29_v1  ;;  %v150_v9 = vpop.f32.mrf.mxu0  ;;  %v163_v10 = vpop.f32.mrf.mxu1 }
  0xa1   :  { %vm197_vm8 = vcmp.ge.f32.partialorder %v175_v7, 0.0  ;;  %v205_v11 = vmul.f32 0.2, %v175_v7  ;;  %vm198_vm9 = vcmp.ge.f32.partialorder %v188_v8, 0.0  ;;  %v206_v12 = vmul.f32 0.2, %v188_v8 }
  0xa3   :  { %v213_v13 = vsel %vm197_vm8, %v175_v7, %v205_v11  ;;  %v214_v14 = vsel %vm198_vm9, %v188_v8, %v206_v12 }
  0xa4   :  { %v218_v15 = vpack.c.bf16 %v214_v14, %v213_v13 }
  0xa6   :  { %222 = vst [vmem:[%s304_s3 + $0x18] sm:$0xff] %v218_v15  ;;  %v176_v16 = vpop.f32.mrf.mxu2  ;;  %v189_v17 = vpop.f32.mrf.mxu3 }

// kernel: generator_forward.6
= control target key start
LH: loop header
LB: loop body
LE: loop exit
PB: predicated region body
PF: predicated region fallthrough
CT: control target
= control target key end

     0   :  { %s766_s12 = smov 0   ;;  %s768_s13 = smov 0   ;;  %s837_s0 = inlined_call_operand.vmem [shape: bf16[4,32,256], index: 0, kind: input, shape index: {}]   ;;  %s838_s1 = inlined_call_operand.vmem [shape: bf16[4,256,128], index: 1, kind: input, shape index: {}]   ;;  %s839_s2 = inlined_call_operand.vmem [shape: f32[32,1], index: 2, kind: input, shape index: {}]   ;;  %s840_s3 = inlined_call_operand.vmem [shape: bf16[4,32,128], index: 3, kind: output, shape index: {}]  }
   0x1   :  { %s770_s14 = smov 0  }
   0x2 LB: > { %s25_s15 = sadd.s32 1, %s739_s13  ;;  %p555_p0 = scmp.ge.s32.totalorder %s743_s14, 1  ;;  %s743_s14 = sphi %s770_s14, %s13_s14   ;;  %s739_s13 = sphi %s768_s13, %s842_s13   ;;  %s735_s12 = sphi %s766_s12, %s841_s12  }
   0x3   : > { %p27_p1 = scmp.ge.s32.totalorder %s25_s15, 4  ;;  %p166_p2 = scmp.lt.s32.totalorder %s743_s14, 5 }
   0x5   : > { %s844_s15 = smov (%p27_p1, %s25_s15), 0  ;;  %p167_p3 = pnand %p555_p0, %p166_p2 }
   0x6   : > { %p201_p4 = scmp.lt.s32.totalorder (!%p167_p3), %s735_s12, 3 }
   0x7   : > { %170 = sbr.rel (%p167_p3) target bundleno = 197 (0xc5), region = 32 }
   0xc   : > { %s846_s12 = smov (!%p201_p4, %s735_s12), 3  ;;  %v745_v4 = vmov 0   ;;  %v260_v7 = vld [vmem:[%s839_s2 + $0x10] sm:$0xff]  ;;  %v258_v8 = vld [vmem:[%s839_s2] sm:$0xff]  ;;  %v261_v12 = vld [vmem:[%s839_s2 + $0x18] sm:$0xff] }
   0xd   : > { %s645_s16 = sshll.u32 %s846_s12, 7  ;;  %720 = vset.pattern.permute.xlu1 %v745_v4  ;;  %719 = vset.pattern.permute.xlu0 %v745_v4  ;;  %v259_v13 = vld [vmem:[%s839_s2 + $0x8] sm:$0xff]  ;;  %s644_s28 = sshll.u32 %s846_s12, 5 }
   0xe   : > { %s790_s19 = scalar_lea.vmem %s838_s1, %s645_s16  ;;  %274 = vperm.xlu1 %720, %v260_v7   ;;  %264 = vperm.xlu0 %719, %v258_v8   ;;  %s205_s4 = scalar_lea.vmem %s837_s0, %s644_s28 }
   0xf   : > { %v658_v0 = vld [vmem:[%s790_s19 + $0x38] sm:$0xff]  ;;  %v657_v2 = vld [vmem:[%s790_s19 + $0x30] sm:$0xff]  ;;  %v656_v5 = vld [vmem:[%s790_s19 + $0x28] sm:$0xff]  ;;  %s646_s5 = sshll.u32 %s846_s12, 4 }
  0x10   : > { %v666_v1 = vld [vmem:[%s790_s19 + $0x78] sm:$0xff]  ;;  %398 = vmatpush.bf16.msra.mxu0 %v658_v0  ;;  %678 = vmatpush.bf16.msra.mxu2 %v658_v0  ;;  %v665_v3 = vld [vmem:[%s790_s19 + $0x70] sm:$0xff]  ;;  %v664_v6 = vld [vmem:[%s790_s19 + $0x68] sm:$0xff]  ;;  %s221_s8 = scalar_lea.vmem %s840_s3, %s646_s5 }
  0x11   : > { %417 = vmatpush.bf16.msra.mxu1 %v666_v1  ;;  %686 = vmatpush.bf16.msra.mxu3 %v666_v1  ;;  %v655_v9 = vld [vmem:[%s790_s19 + $0x20] sm:$0xff]  ;;  %v654_v11 = vld [vmem:[%s790_s19 + $0x18] sm:$0xff]  ;;  %v653_v15 = vld [vmem:[%s790_s19 + $0x10] sm:$0xff] }
  0x12   : > { %v663_v10 = vld [vmem:[%s790_s19 + $0x60] sm:$0xff]  ;;  %v662_v14 = vld [vmem:[%s790_s19 + $0x58] sm:$0xff]  ;;  %v661_v16 = vld [vmem:[%s790_s19 + $0x50] sm:$0xff] }
  0x13   : > { %v652_v17 = vld [vmem:[%s790_s19 + $0x8] sm:$0xff]  ;;  %v651_v19 = vld [vmem:[%s790_s19] sm:$0xff]  ;;  %v572_v23 = vld [vmem:[%s205_s4 + $0x10] sm:$0xf] }
  0x14   : > { %399 = vmatpush.bf16.msra.mxu0 %v657_v2  ;;  %679 = vmatpush.bf16.msra.mxu2 %v657_v2  ;;  %v660_v18 = vld [vmem:[%s790_s19 + $0x48] sm:$0xff]  ;;  %v659_v20 = vld [vmem:[%s790_s19 + $0x40] sm:$0xff]  ;;  %v650_v24 = vld [vmem:[%s205_s4 + $0x14] sm:$0xf0] }
  0x15   : > { %418 = vmatpush.bf16.msra.mxu1 %v665_v3  ;;  %687 = vmatpush.bf16.msra.mxu3 %v665_v3  ;;  %v564_v21 = vld [vmem:[%s205_s4] sm:$0xf]  ;;  %v648_v22 = vld [vmem:[%s205_s4 + $0x4] sm:$0xf0]  ;;  %v647_v25 = vld [vmem:[%s205_s4 + $0x4] sm:$0xf]  ;;  %v573_v30 = vor.u32 %v650_v24, %v572_v23 }
  0x16   : > { %279 = vperm.xlu1 %720, %v261_v12   ;;  %269 = vperm.xlu0 %719, %v259_v13   ;;  %v566_v26 = vld [vmem:[%s205_s4 + $0x8] sm:$0xf0]  ;;  %v649_v27 = vld [vmem:[%s205_s4 + $0x14] sm:$0xf]  ;;  %v574_v28 = vld [vmem:[%s205_s4 + $0x18] sm:$0xf0]  ;;  %v565_v29 = vor.u32 %v648_v22, %v564_v21 }
  0x17   : > { %v569_v31 = vor.u32 %v647_v25, %v566_v26  ;;  %v577_v32 = vor.u32 %v649_v27, %v574_v28 }
  0x18   : > { %400 = vmatpush.bf16.msra.mxu0 %v656_v5  ;;  %680 = vmatpush.bf16.msra.mxu2 %v656_v5 }
  0x19   : > { %419 = vmatpush.bf16.msra.mxu1 %v664_v6  ;;  %688 = vmatpush.bf16.msra.mxu3 %v664_v6 }
  0x1c   : > { %401 = vmatpush.bf16.msra.mxu0 %v655_v9  ;;  %681 = vmatpush.bf16.msra.mxu2 %v655_v9 }
  0x1d   : > { %420 = vmatpush.bf16.msra.mxu1 %v663_v10  ;;  %689 = vmatpush.bf16.msra.mxu3 %v663_v10 }
  0x20   : > { %402 = vmatpush.bf16.msra.mxu0 %v654_v11  ;;  %682 = vmatpush.bf16.msra.mxu2 %v654_v11 }
  0x21   : > { %421 = vmatpush.bf16.msra.mxu1 %v662_v14  ;;  %690 = vmatpush.bf16.msra.mxu3 %v662_v14 }
  0x24   : > { %403 = vmatpush.bf16.msra.mxu0 %v653_v15  ;;  %683 = vmatpush.bf16.msra.mxu2 %v653_v15 }
  0x25   : > { %422 = vmatpush.bf16.msra.mxu1 %v661_v16  ;;  %691 = vmatpush.bf16.msra.mxu3 %v661_v16 }
  0x28   : > { %404 = vmatpush.bf16.msra.mxu0 %v652_v17  ;;  %684 = vmatpush.bf16.msra.mxu2 %v652_v17 }
  0x29   : > { %423 = vmatpush.bf16.msra.mxu1 %v660_v18  ;;  %692 = vmatpush.bf16.msra.mxu3 %v660_v18 }
  0x2c   : > { %405 = vmatpush.bf16.msra.mxu0 %v651_v19  ;;  %685 = vmatpush.bf16.msra.mxu2 %v651_v19 }
  0x2d   : > { %424 = vmatpush.bf16.msra.mxu1 %v659_v20  ;;  %693 = vmatpush.bf16.msra.mxu3 %v659_v20 }
  0x2f   : > { %406 = vmatmul.bf16.vlgmr.msra.gmra.mxu0 %v565_v29  ;;  %411 = vmatmul.bf16.vlgmr.msra.gmra.mxu2 %v573_v30 }
  0x30   : > { %425 = vmatmul.bf16.vlgmr.msra.gmra.mxu1 %v569_v31  ;;  %430 = vmatmul.bf16.vlgmr.msra.gmra.mxu3 %v577_v32 }
  0x80   : > { %v265_v33 = vpop.permute.xlu0 %264  ;;  %v275_v37 = vpop.permute.xlu1 %274 }
  0x88   : > { %v270_v41 = vpop.permute.xlu0 %269  ;;  %v280_v50 = vpop.permute.xlu1 %279 }
  0xac   : > { %v407_v34 = vpop.f32.mrf.mxu0 }
  0xad   : > { %v426_v35 = vpop.f32.mrf.mxu1  ;;  %v408_v36 = vadd.f32 %v407_v34, %v265_v33 }
  0xaf   : > { %v427_v39 = vadd.f32 %v426_v35, %v408_v36 }
  0xb1   : > { %v440_v46 = vmul.f32 0.2, %v427_v39  ;;  %vm436_vm0 = vcmp.ge.f32.partialorder %v427_v39, 0.0 }
  0xb2   : > { %v412_v38 = vpop.f32.mrf.mxu2 }
  0xb3   : > { %v431_v40 = vpop.f32.mrf.mxu3  ;;  %v413_v43 = vadd.f32 %v412_v38, %v275_v37  ;;  %v444_v52 = vsel %vm436_vm0, %v427_v39, %v440_v46 }
  0xb4   : > { %v409_v42 = vpop.f32.mrf.mxu0 }
  0xb5   : > { %v410_v44 = vadd.f32 %v409_v42, %v270_v41  ;;  %v428_v45 = vpop.f32.mrf.mxu1  ;;  %v432_v48 = vadd.f32 %v431_v40, %v413_v43 }
  0xb7   : > { %v429_v47 = vadd.f32 %v428_v45, %v410_v44  ;;  %v442_v57 = vmul.f32 0.2, %v432_v48  ;;  %vm438_vm2 = vcmp.ge.f32.partialorder %v432_v48, 0.0 }
  0xb9   : > { %vm437_vm1 = vcmp.ge.f32.partialorder %v429_v47, 0.0  ;;  %v441_v49 = vmul.f32 0.2, %v429_v47  ;;  %v446_v60 = vsel %vm438_vm2, %v432_v48, %v442_v57 }
  0xba   : > { %v414_v51 = vpop.f32.mrf.mxu2 }
  0xbb   : > { %v445_v53 = vsel %vm437_vm1, %v429_v47, %v441_v49  ;;  %v415_v54 = vadd.f32 %v414_v51, %v280_v50  ;;  %v433_v56 = vpop.f32.mrf.mxu3 }
  0xbc   : > { %v670_v55 = vpack.c.bf16 %v445_v53, %v444_v52 }
  0xbd   : > { %v434_v58 = vadd.f32 %v433_v56, %v415_v54 }
  0xbe   : > { %671 = vst [vmem:[%s221_s8] sm:$0xff] %v670_v55  }
  0xbf   : > { %vm439_vm3 = vcmp.ge.f32.partialorder %v434_v58, 0.0  ;;  %v443_v59 = vmul.f32 0.2, %v434_v58 }
  0xc1   : > { %v447_v61 = vsel %vm439_vm3, %v434_v58, %v443_v59 }
  0xc2   : > { %v675_v62 = vpack.c.bf16 %v447_v61, %v446_v60 }
  0xc4   : > { %677 = vst [vmem:[%s221_s8 + $0x8] sm:$0xff] %v675_v62  }
  0xc5 PF: > { %s13_s14 = sadd.s32 1, %s743_s14   ;;  %s841_s12 = smov %s739_s13 }
  0xc6   : > { %p10_p5 = scmp.ge.s32.totalorder %s13_s14, 6   ;;  %s842_s13 = smov %s844_s15 }
  0xc8   :  { %12 = sbr.rel (!%p10_p5) target bundleno = 2 (0x2), region = 65 }

// kernel: generator_forward.7
= control target key start
LH: loop header
LB: loop body
LE: loop exit
PB: predicated region body
PF: predicated region fallthrough
CT: control target
= control target key end

     0   :  { %s562_s12 = smov 0   ;;  %s564_s13 = smov 0   ;;  %s608_s0 = inlined_call_operand.vmem [shape: bf16[4,16,128], index: 0, kind: input, shape index: {}]   ;;  %s609_s1 = inlined_call_operand.vmem [shape: bf16[4,128,128], index: 1, kind: input, shape index: {}]   ;;  %s610_s2 = inlined_call_operand.vmem [shape: f32[16,1], index: 2, kind: input, shape index: {}]   ;;  %s611_s3 = inlined_call_operand.vmem [shape: bf16[4,16,128], index: 3, kind: output, shape index: {}]  }
   0x1   :  { %s566_s14 = smov 0  }
   0x2 LB: > { %s25_s15 = sadd.s32 1, %s535_s13  ;;  %p429_p0 = scmp.ge.s32.totalorder %s539_s14, 1  ;;  %s539_s14 = sphi %s566_s14, %s13_s14   ;;  %s535_s13 = sphi %s564_s13, %s613_s13   ;;  %s531_s12 = sphi %s562_s12, %s612_s12  }
   0x3   : > { %p27_p1 = scmp.ge.s32.totalorder %s25_s15, 4  ;;  %p166_p2 = scmp.lt.s32.totalorder %s539_s14, 5 }
   0x5   : > { %s615_s15 = smov (%p27_p1, %s25_s15), 0  ;;  %p167_p3 = pnand %p429_p0, %p166_p2 }
   0x6   : > { %p201_p4 = scmp.lt.s32.totalorder (!%p167_p3), %s531_s12, 3 }
   0x7   : > { %170 = sbr.rel (%p167_p3) target bundleno = 189 (0xbd), region = 32 }
   0xc   : > { %s617_s12 = smov (!%p201_p4, %s531_s12), 3  ;;  %v541_v2 = vmov 0   ;;  %v240_v3 = vld [vmem:[%s610_s2] sm:$0xff]  ;;  %v241_v5 = vld [vmem:[%s610_s2 + $0x8] sm:$0xff] }
   0xd   : > { %s475_s16 = sshll.u32 %s617_s12, 6  ;;  %516 = vset.pattern.permute.xlu0 %v541_v2  ;;  %s474_s24 = sshll.u32 %s617_s12, 3 }
   0xe   : > { %s213_s19 = scalar_lea.vmem %s609_s1, %s475_s16  ;;  %244 = vperm.xlu0 %516, %v240_v3   ;;  %s205_s27 = scalar_lea.vmem %s608_s0, %s474_s24 }
   0xf   : > { %v485_v0 = vld [vmem:[%s213_s19 + $0x38] sm:$0xff]  ;;  %v484_v1 = vld [vmem:[%s213_s19 + $0x30] sm:$0xff]  ;;  %v483_v4 = vld [vmem:[%s213_s19 + $0x28] sm:$0xff]  ;;  %s221_s30 = scalar_lea.vmem %s611_s3, %s474_s24 }
  0x10   : > { %306 = vmatpush.bf16.msra.mxu0 %v485_v0  ;;  %v482_v6 = vld [vmem:[%s213_s19 + $0x20] sm:$0xff]  ;;  %v481_v7 = vld [vmem:[%s213_s19 + $0x18] sm:$0xff]  ;;  %v480_v8 = vld [vmem:[%s213_s19 + $0x10] sm:$0xff] }
  0x11   : > { %v479_v9 = vld [vmem:[%s213_s19 + $0x8] sm:$0xff]  ;;  %v478_v10 = vld [vmem:[%s213_s19] sm:$0xff] }
  0x12   : > { %v477_v11 = vld [vmem:[%s205_s27] sm:$0xff] }
  0x14   : > { %307 = vmatpush.bf16.msra.mxu0 %v484_v1 }
  0x16   : > { %249 = vperm.xlu0 %516, %v241_v5  }
  0x18   : > { %308 = vmatpush.bf16.msra.mxu0 %v483_v4 }
  0x1c   : > { %309 = vmatpush.bf16.msra.mxu0 %v482_v6 }
  0x20   : > { %310 = vmatpush.bf16.msra.mxu0 %v481_v7 }
  0x24   : > { %311 = vmatpush.bf16.msra.mxu0 %v480_v8 }
  0x28   : > { %312 = vmatpush.bf16.msra.mxu0 %v479_v9 }
  0x2c   : > { %313 = vmatpush.bf16.msra.mxu0 %v478_v10 }
  0x2f   : > { %314 = vmatmul.bf16.vlgmr.msra.gmra.mxu0 %v477_v11 }
  0x80   : > { %v245_v12 = vpop.permute.xlu0 %244 }
  0x88   : > { %v250_v15 = vpop.permute.xlu0 %249 }
  0xac   : > { %v315_v13 = vpop.f32.mrf.mxu0 }
  0xad   : > { %v316_v14 = vadd.f32 %v315_v13, %v245_v12 }
  0xaf   : > { %v322_v17 = vmul.f32 0.2, %v316_v14  ;;  %vm320_vm0 = vcmp.ge.f32.partialorder %v316_v14, 0.0 }
  0xb1   : > { %v324_v20 = vsel %vm320_vm0, %v316_v14, %v322_v17 }
  0xb4   : > { %v317_v16 = vpop.f32.mrf.mxu0 }
  0xb5   : > { %v318_v18 = vadd.f32 %v317_v16, %v250_v15 }
  0xb7   : > { %vm321_vm1 = vcmp.ge.f32.partialorder %v318_v18, 0.0  ;;  %v323_v19 = vmul.f32 0.2, %v318_v18 }
  0xb9   : > { %v325_v21 = vsel %vm321_vm1, %v318_v18, %v323_v19 }
  0xba   : > { %v489_v22 = vpack.c.bf16 %v325_v21, %v324_v20 }
  0xbc   : > { %490 = vst [vmem:[%s221_s30] sm:$0xff] %v489_v22  }
  0xbd PF: > { %s13_s14 = sadd.s32 1, %s539_s14   ;;  %s612_s12 = smov %s535_s13 }
  0xbe   : > { %p10_p5 = scmp.ge.s32.totalorder %s13_s14, 6   ;;  %s613_s13 = smov %s615_s15 }
  0xc0   :  { %12 = sbr.rel (!%p10_p5) target bundleno = 2 (0x2), region = 65 }

// kernel: generator_forward.8
= control target key start
LH: loop header
LB: loop body
LE: loop exit
PB: predicated region body
PF: predicated region fallthrough
CT: control target
= control target key end

     0   :  { %s583_s12 = smov 0   ;;  %s585_s13 = smov 0   ;;  %s627_s0 = inlined_call_operand.vmem [shape: bf16[2,8,32], index: 0, kind: input, shape index: {}]   ;;  %s628_s1 = inlined_call_operand.vmem [shape: bf16[2,32,512], index: 1, kind: input, shape index: {}]   ;;  %s629_s2 = inlined_call_operand.vmem [shape: f32[8,1], index: 2, kind: input, shape index: {}]   ;;  %s630_s3 = inlined_call_operand.vmem [shape: bf16[2,8,512], index: 3, kind: output, shape index: {}]  }
   0x1   :  { %s587_s14 = smov 0  }
   0x2 LB: > { %s25_s15 = sadd.s32 1, %s556_s13  ;;  %p458_p0 = scmp.ge.s32.totalorder %s560_s14, 1  ;;  %s560_s14 = sphi %s587_s14, %s13_s14   ;;  %s556_s13 = sphi %s585_s13, %s632_s13   ;;  %s552_s12 = sphi %s583_s12, %s631_s12  }
   0x3   : > { %p27_p1 = scmp.ge.s32.totalorder %s25_s15, 2  ;;  %p167_p2 = scmp.lt.s32.totalorder %s560_s14, 3 }
   0x5   : > { %s634_s15 = smov (%p27_p1, %s25_s15), 0  ;;  %p168_p3 = pnand %p458_p0, %p167_p2 }
   0x6   : > { %p203_p4 = scmp.lt.s32.totalorder (!%p168_p3), %s552_s12, 1 }
   0x7   : > { %171 = sbr.rel (%p168_p3) target bundleno = 167 (0xa7), region = 32 }
   0xc   : > { %v237_v0 = vld [vmem:[%s629_s2] sm:$0xff]  ;;  %v562_v1 = vmov 0   ;;  %s636_s12 = smov (!%p203_p4, %s552_s12), 1  ;;  %vm283_vm0 = vcmask 261120  }
   0xd   : > { %537 = vset.pattern.permute.xlu0 %v562_v1  ;;  %s502_s18 = sshll.u32 %s636_s12, 6  ;;  %s459_s22 = sshll.u32 %s636_s12, 2 }
   0xe   : > { %240 = vperm.xlu0 %537, %v237_v0   ;;  %s215_s21 = scalar_lea.vmem %s628_s1, %s502_s18  ;;  %s206_s25 = scalar_lea.vmem %s627_s0, %s459_s22 }
   0xf   : > { %v482_v2 = vld [vmem:[%s215_s21 + $0x20] sm:$0xf]  ;;  %v510_v3 = vld [vmem:[%s215_s21 + $0x2c] sm:$0xf0]  ;;  %v508_v4 = vld [vmem:[%s215_s21 + $0x24] sm:$0xf] }
  0x10   : > { %v483_v5 = vor.u32 %v510_v3, %v482_v2  ;;  %v484_v6 = vld [vmem:[%s215_s21 + $0x30] sm:$0xf0]  ;;  %v490_v7 = vld [vmem:[%s215_s21 + $0x28] sm:$0xf]  ;;  %v511_v8 = vld [vmem:[%s215_s21 + $0x34] sm:$0xf0] }
  0x11   : > { %v487_v9 = vor.u32 %v508_v4, %v484_v6  ;;  %v491_v10 = vor.u32 %v511_v8, %v490_v7  ;;  %v509_v11 = vld [vmem:[%s215_s21 + $0x2c] sm:$0xf]  ;;  %v492_v12 = vld [vmem:[%s215_s21 + $0x38] sm:$0xf0]  ;;  %v466_v13 = vld [vmem:[%s215_s21] sm:$0xf] }
  0x12   : > { %293 = vmatpush.bf16.msra.mxu0 %v483_v5  ;;  %v495_v14 = vor.u32 %v509_v11, %v492_v12  ;;  %v506_v15 = vld [vmem:[%s215_s21 + $0xc] sm:$0xf0]  ;;  %v504_v16 = vld [vmem:[%s215_s21 + $0x4] sm:$0xf]  ;;  %v468_v17 = vld [vmem:[%s215_s21 + $0x10] sm:$0xf0] }
  0x13   : > { %306 = vmatpush.bf16.msra.mxu1 %v487_v9  ;;  %319 = vmatpush.bf16.msra.mxu2 %v491_v10  ;;  %v467_v18 = vor.u32 %v506_v15, %v466_v13  ;;  %v471_v19 = vor.u32 %v504_v16, %v468_v17  ;;  %v474_v20 = vld [vmem:[%s215_s21 + $0x8] sm:$0xf]  ;;  %v507_v21 = vld [vmem:[%s215_s21 + $0x14] sm:$0xf0]  ;;  %v505_v22 = vld [vmem:[%s215_s21 + $0xc] sm:$0xf] }
  0x14   : > { %332 = vmatpush.bf16.msra.mxu3 %v495_v14  ;;  %v475_v23 = vor.u32 %v507_v21, %v474_v20  ;;  %v476_v24 = vld [vmem:[%s215_s21 + $0x18] sm:$0xf0]  ;;  %v228_v26 = vld [vmem:[%s206_s25] sm:$0xf]  ;;  %s503_s26 = sshll.u32 %s636_s12, 4 }
  0x15   : > { %v479_v25 = vor.u32 %v505_v22, %v476_v24  ;;  %s225_s29 = scalar_lea.vmem %s630_s3, %s503_s26 }
  0x16   : > { %294 = vmatpush.bf16.msra.mxu0 %v467_v18 }
  0x17   : > { %307 = vmatpush.bf16.msra.mxu1 %v471_v19  ;;  %320 = vmatpush.bf16.msra.mxu2 %v475_v23 }
  0x18   : > { %333 = vmatpush.bf16.msra.mxu3 %v479_v25 }
  0x19   : > { %496 = vmatmul.msk.bf16.vlgmr.msra.gmra.mxu0 %vm283_vm0, %v228_v26 }
  0x1a   : > { %497 = vmatmul.msk.bf16.vlgmr.msra.gmra.mxu1 %vm283_vm0, %v228_v26  ;;  %498 = vmatmul.msk.bf16.vlgmr.msra.gmra.mxu2 %vm283_vm0, %v228_v26 }
  0x1b   : > { %499 = vmatmul.msk.bf16.vlgmr.msra.gmra.mxu3 %vm283_vm0, %v228_v26 }
  0x80   : > { %v241_v27 = vpop.permute.xlu0 %240 }
  0x96   : > { %v296_v28 = vpop.f32.mrf.mxu0 }
  0x97   : > { %v309_v29 = vpop.f32.mrf.mxu1  ;;  %v297_v30 = vadd.f32 %v296_v28, %v241_v27 }
  0x98   : > { %v310_v31 = vadd.f32 %v309_v29, %v241_v27 }
  0x99   : > { %vm339_vm1 = vcmp.ge.f32.partialorder %v297_v30, 0.0  ;;  %v343_v32 = vmul.f32 0.2, %v297_v30 }
  0x9a   : > { %vm340_vm2 = vcmp.ge.f32.partialorder %v310_v31, 0.0  ;;  %v344_v33 = vmul.f32 0.2, %v310_v31 }
  0x9b   : > { %v347_v34 = vsel %vm339_vm1, %v297_v30, %v343_v32 }
  0x9c   : > { %v348_v35 = vsel %vm340_vm2, %v310_v31, %v344_v33 }
  0x9d   : > { %v351_v36 = vpack.c.bf16 %v348_v35, %v347_v34  ;;  %v322_v37 = vpop.f32.mrf.mxu2 }
  0x9e   : > { %v323_v38 = vadd.f32 %v322_v37, %v241_v27  ;;  %v335_v39 = vpop.f32.mrf.mxu3  ;;  %v298_v40 = vpop.f32.mrf.mxu0 }
  0x9f   : > { %v336_v41 = vadd.f32 %v335_v39, %v241_v27  ;;  %353 = vst [vmem:[%s225_s29] sm:$0xff] %v351_v36  ;;  %v311_v42 = vpop.f32.mrf.mxu1 }
  0xa0   : > { %vm341_vm3 = vcmp.ge.f32.partialorder %v323_v38, 0.0  ;;  %v345_v43 = vmul.f32 0.2, %v323_v38 }
  0xa1   : > { %vm342_vm4 = vcmp.ge.f32.partialorder %v336_v41, 0.0  ;;  %v346_v44 = vmul.f32 0.2, %v336_v41 }
  0xa2   : > { %v349_v45 = vsel %vm341_vm3, %v323_v38, %v345_v43 }
  0xa3   : > { %v350_v46 = vsel %vm342_vm4, %v336_v41, %v346_v44 }
  0xa4   : > { %v352_v47 = vpack.c.bf16 %v350_v46, %v349_v45 }
  0xa5   : > { %v324_v48 = vpop.f32.mrf.mxu2 }
  0xa6   : > { %354 = vst [vmem:[%s225_s29 + $0x8] sm:$0xff] %v352_v47  ;;  %v337_v49 = vpop.f32.mrf.mxu3 }
  0xa7 PF: > { %s13_s14 = sadd.s32 1, %s560_s14   ;;  %s631_s12 = smov %s556_s13 }
  0xa8   : > { %p10_p5 = scmp.ge.s32.totalorder %s13_s14, 4   ;;  %s632_s13 = smov %s634_s15 }
  0xaa   :  { %12 = sbr.rel (!%p10_p5) target bundleno = 2 (0x2), region = 65 }

// kernel: generator_forward.9
= control target key start
LH: loop header
LB: loop body
LE: loop exit
PB: predicated region body
PF: predicated region fallthrough
CT: control target
= control target key end

     0   :  { %s654_s12 = smov 0   ;;  %s656_s13 = smov 0   ;;  %s756_s0 = inlined_call_operand.vmem [shape: bf16[2,2,16], index: 0, kind: input, shape index: {}]   ;;  %s757_s1 = inlined_call_operand.vmem [shape: bf16[2,16,1024], index: 1, kind: input, shape index: {}]   ;;  %s758_s2 = inlined_call_operand.vmem [shape: f32[2,1], index: 2, kind: input, shape index: {}]   ;;  %s759_s3 = inlined_call_operand.vmem [shape: f32[2,2,1024], index: 3, kind: output, shape index: {}]  }
   0x1   :  { %s658_s14 = smov 0   ;;  %s660_s15 = smov 0  }
   0x2   :  { %s662_s16 = smov 0   ;;  %s664_s17 = smov 0  }
   0x3   :  { %s666_s18 = smov 0  }
   0x4 LB: > { %s22_s19 = sadd.s32 1, %s623_s16  ;;  %s25_s20 = sadd.s32 1, %s627_s17  ;;  %s631_s18 = sphi %s666_s18, %s13_s18   ;;  %s627_s17 = sphi %s664_s17, %s765_s17   ;;  %s623_s16 = sphi %s662_s16, %s764_s16   ;;  %s619_s15 = sphi %s660_s15, %s763_s15   ;;  %s615_s14 = sphi %s658_s14, %s762_s14   ;;  %s611_s13 = sphi %s656_s13, %s761_s13   ;;  %s607_s12 = sphi %s654_s12, %s760_s12  }
   0x5   : > { %p23_p0 = scmp.ge.s32.totalorder %s22_s19, 2  ;;  %p67_p1 = scmp.ne.s32.totalorder %s611_s13, %s607_s12 }
   0x6   : > { %p68_p2 = scmp.eq.s32.totalorder %s631_s18, 0  ;;  %s60_s24 = sadd.s32 1, %s611_s13 }
   0x7   : > { %s767_s19 = smov (%p23_p0, %s22_s19), 0  ;;  %s769_s20 = smov (!%p23_p0, %s25_s20), %s627_s17 }
   0x8   : > { %p69_p3 = por %p68_p2, %p67_p1  ;;  %p27_p4 = scmp.ge.s32.totalorder %s769_s20, 2 }
   0x9   : > { %s56_s21 = ssub.s32 %s623_s16, %s767_s19  ;;  %p467_p6 = scmp.ge.s32.totalorder %s631_s18, 4 }
   0xa   : > { %s771_s20 = smov (%p27_p4, %s769_s20), 0 }
   0xb   : > { %s55_s22 = ssub.s32 %s627_s17, %s771_s20  ;;  %145 = sbr.rel (%p467_p6) target bundleno = 27 (0x1b), region = 20 }
   0xc   : > { %s57_s23 = sor.u32 %s56_s21, %s55_s22 }
   0xd   : > { %p58_p5 = scmp.eq.s32.totalorder %s57_s23, 0 }
   0xf   : > { %s705_s25 = scalar_select %p58_p5, %s611_s13, %s60_s24  }
  0x10   : > { %154 = sbr.rel (!%p69_p3) target bundleno = 27 (0x1b), region = 28  ;;  %s156_s26 = sand.u32 (%p69_p3), 1, %s611_s13  }
  0x11   : > { %s469_s27 = sshll.u32 (%p69_p3), %s623_s16, 2  ;;  %s468_s28 = sshll.u32 (%p69_p3), %s156_s26, 5 }
  0x12   : > { %s470_s29 = sshll.u32 (%p69_p3), %s627_s17, 4  ;;  %s158_s8 = scalar_lea.vmem (%p69_p3), [#allocation2], %s468_s28 }
  0x13   : > { %s161_s30 = sadd.s32 (%p69_p3), %s470_s29, %s469_s27 }
  0x14   : > { %s471_s4 = sshll.u32 (%p69_p3), %s161_s30, 2 }
  0x15   : > { %s163_s7 = scalar_lea.vmem %s757_s1, %s471_s4 }
  0x16   : > { %v176_v0 = vld [vmem:[%s163_s7] sm:$0xff]  ;;  %v178_v1 = vld [vmem:[%s163_s7 + $0x8] sm:$0xff] }
  0x17   : > { %v180_v2 = vld [vmem:[%s163_s7 + $0x20] sm:$0xff]  ;;  %177 = vst [vmem:[%s158_s8] sm:$0xff] %v176_v0  ;;  %v182_v3 = vld [vmem:[%s163_s7 + $0x28] sm:$0xff] }
  0x18   : > { %179 = vst [vmem:[%s158_s8 + $0x8] sm:$0xff] %v178_v1 }
  0x19   : > { %181 = vst [vmem:[%s158_s8 + $0x10] sm:$0xff] %v180_v2 }
  0x1a   : > { %183 = vst [vmem:[%s158_s8 + $0x18] sm:$0xff] %v182_v3 }
  0x1b PF: > { %p472_p7 = scmp.ge.s32.totalorder %s631_s18, 1  ;;  %p188_p8 = scmp.lt.s32.totalorder %s631_s18, 5 }
  0x1d   : > { %p189_p9 = pnand %p472_p7, %p188_p8 }
  0x1e   : > { %s195_s9 = sand.u32 (!%p189_p9), 1, %s607_s12   ;;  %p225_p10 = scmp.lt.s32.totalorder (!%p189_p9), %s619_s15, 1 }
  0x1f   : > { %192 = sbr.rel (%p189_p9) target bundleno = 204 (0xcc), region = 51  ;;  %s473_s21 = sshll.u32 (!%p189_p9), %s195_s9, 5 }
  0x20   : > { %s197_s22 = scalar_lea.vmem (!%p189_p9), [#allocation2], %s473_s21  ;;  %s474_s26 = sshll.u32 (!%p189_p9), %s615_s14, 2 }
  0x21   : > { %p232_p11 = scmp.lt.s32.totalorder (!%p189_p9), %s474_s26, 7 }
  0x24   : > { %v245_v4 = vld [vmem:[%s758_s2] sm:$0x3]  ;;  %v633_v5 = vmov 0   ;;  %v501_v7 = vld [vmem:[%s197_s22 + $0xc] sm:$0xf0]  ;;  %s773_s15 = smov (!%p225_p10, %s619_s15), 1 }
  0x25   : > { %560 = vset.pattern.permute.xlu0 %v633_v5  ;;  %v479_v6 = vld [vmem:[%s197_s22] sm:$0xf]  ;;  %v499_v8 = vld [vmem:[%s197_s22 + $0x4] sm:$0xf]  ;;  %v481_v10 = vld [vmem:[%s197_s22 + $0x10] sm:$0xf0]  ;;  %s227_s24 = scalar_lea.vmem %s756_s0, %s773_s15 }
  0x26   : > { %248 = vperm.xlu0 %560, %v245_v4   ;;  %v480_v9 = vor.u32 %v501_v7, %v479_v6  ;;  %v487_v11 = vld [vmem:[%s197_s22 + $0x8] sm:$0xf]  ;;  %v502_v12 = vld [vmem:[%s197_s22 + $0x14] sm:$0xf0]  ;;  %v484_v13 = vor.u32 %v499_v8, %v481_v10  ;;  %v500_v15 = vld [vmem:[%s197_s22 + $0xc] sm:$0xf] }
  0x27   : > { %v488_v14 = vor.u32 %v502_v12, %v487_v11  ;;  %v489_v16 = vld [vmem:[%s197_s22 + $0x18] sm:$0xf0]  ;;  %vm271_vm0 = vcmask 130048   ;;  %v240_v18 = vld [vmem:[%s227_s24] sm:$0x1]  ;;  %s775_s26 = smov (!%p232_p11, %s474_s26), 7 }
  0x28   : > { %282 = vmatpush.bf16.msra.mxu0 %v480_v9  ;;  %v492_v17 = vor.u32 %v500_v15, %v489_v16  ;;  %295 = vmatpush.bf16.msra.mxu1 %v484_v13  ;;  %s475_s27 = sshll.u32 %s773_s15, 3  ;;  %vm354_vm1 = vcmask 1041408   ;;  %vm356_vm2 = vcmask 1045508   ;;  %vm358_vm3 = vcmask 1043456  }
  0x29   : > { %308 = vmatpush.bf16.msra.mxu2 %v488_v14  ;;  %s235_s28 = sadd.s32 %s475_s27, %s775_s26 }
  0x2a   : > { %321 = vmatpush.bf16.msra.mxu3 %v492_v17  ;;  %s476_s14 = sshll.u32 %s235_s28, 1 }
  0x2b   : > { %493 = vmatmul.msk.bf16.vlgmr.msra.gmra.mxu0 %vm271_vm0, %v240_v18  ;;  %494 = vmatmul.msk.bf16.vlgmr.msra.gmra.mxu1 %vm271_vm0, %v240_v18  ;;  %s237_s4 = scalar_lea.vmem %s759_s3, %s476_s14 }
  0x2c   : > { %495 = vmatmul.msk.bf16.vlgmr.msra.gmra.mxu2 %vm271_vm0, %v240_v18 }
  0x2d   : > { %496 = vmatmul.msk.bf16.vlgmr.msra.gmra.mxu3 %vm271_vm0, %v240_v18 }
  0x98   : > { %v249_v19 = vpop.permute.xlu0 %248 }
  0xa8   : > { %v284_v20 = vpop.f32.mrf.mxu0  ;;  %v297_v21 = vpop.f32.mrf.mxu1 }
  0xa9   : > { %v285_v22 = vadd.f32 %v284_v20, %v249_v19  ;;  %v298_v23 = vadd.f32 %v297_v21, %v249_v19 }
  0xab   : > { %v327_v24 = vsub.f32 0.0, %v285_v22  ;;  %v328_v25 = vsub.f32 0.0, %v298_v23 }
  0xad   : > { %v331_v26 = vmul.f32 1.442695, %v327_v24  ;;  %v333_v27 = vmul.f32 1.442695, %v328_v25 }
  0xaf   : > { %v310_v28 = vpop.f32.mrf.mxu2  ;;  %561 = vpow2.f32 %v333_v27 }
  0xb0   : > { %v311_v29 = vadd.f32 %v310_v28, %v249_v19  ;;  %v323_v30 = vpop.f32.mrf.mxu3  ;;  %v286_v31 = vpop.f32.mrf.mxu0  ;;  %563 = vpow2.f32 %v331_v26 }
  0xb1   : > { %v324_v32 = vadd.f32 %v323_v30, %v249_v19  ;;  %v299_v33 = vpop.f32.mrf.mxu1 }
  0xb2   : > { %v329_v34 = vsub.f32 0.0, %v311_v29 }
  0xb3   : > { %v330_v35 = vsub.f32 0.0, %v324_v32 }
  0xb4   : > { %v335_v36 = vmul.f32 1.442695, %v329_v34 }
  0xb5   : > { %v337_v37 = vmul.f32 1.442695, %v330_v35  ;;  %v562_v38 = vpop.eup %561 }
  0xb6   : > { %565 = vpow2.f32 %v335_v36  ;;  %v564_v39 = vpop.eup %563  ;;  %v340_v41 = vadd.f32 1.0, %v562_v38 }
  0xb7   : > { %567 = vpow2.f32 %v337_v37  ;;  %v312_v40 = vpop.f32.mrf.mxu2  ;;  %v339_v43 = vadd.f32 1.0, %v564_v39 }
  0xb8   : > { %v325_v42 = vpop.f32.mrf.mxu3  ;;  %569 = vrcp.f32 %v340_v41 }
  0xb9   : > { %571 = vrcp.f32 %v339_v43 }
  0xbc   : > { %v566_v44 = vpop.eup %565 }
  0xbd   : > { %v568_v45 = vpop.eup %567  ;;  %v341_v46 = vadd.f32 1.0, %v566_v44 }
  0xbe   : > { %v342_v47 = vadd.f32 1.0, %v568_v45  ;;  %v570_v48 = vpop.eup %569 }
  0xbf   : > { %573 = vrcp.f32 %v341_v46  ;;  %v572_v49 = vpop.eup %571  ;;  %v351_v51 = vrot.slane %v570_v48, 6 }
  0xc0   : > { %575 = vrcp.f32 %v342_v47 }
  0xc1   : > { %v355_v55 = vsel %vm354_vm1, %v572_v49, %v351_v51 }
  0xc5   : > { %v574_v50 = vpop.eup %573 }
  0xc6   : > { %v576_v52 = vpop.eup %575  ;;  %v352_v53 = vrot.slane %v574_v50, 4 }
  0xc7   : > { %v353_v54 = vrot.slane %v576_v52, 2 }
  0xc9   : > { %v357_v56 = vsel %vm356_vm2, %v352_v53, %v353_v54 }
  0xca   : > { %v359_v57 = vsel %vm358_vm3, %v355_v55, %v357_v56 }
  0xcb   : > { %361 = vst [vmem:[%s237_s4] sm:$0xff] %v359_v57 }
  0xcc PF: > { %s13_s18 = sadd.s32 1, %s631_s18   ;;  %s760_s12 = smov %s611_s13 }
  0xcd   : > { %p10_p12 = scmp.ge.s32.totalorder %s13_s18, 6   ;;  %s761_s13 = smov %s705_s25 }
  0xce   : > { %s762_s14 = smov %s623_s16  ;;  %s763_s15 = smov %s627_s17 }
  0xcf   : > { %s764_s16 = smov %s767_s19  ;;  %s765_s17 = smov %s771_s20 }
  0xd0   :  { %12 = sbr.rel (!%p10_p12) target bundleno = 4 (0x4), region = 93 }

</bundles_post_ra>
